<compile_context>
chip_gen: v7x
topology: tpu7x:2x2x1
jax: 0.10.0
libtpu: 0.0.40
codegen_flags: <defaults>
</compile_context>

<pallas_src>
import jax
import jax.numpy as jnp
from jax.experimental import pallas as pl
from jax.experimental.pallas import tpu as pltpu


_LANE = 128
_SUBLANE = 8
# 4 pipeline buffers (2 in + 2 out) x 8 MiB = 32 MiB in flight.
_MAX_BLOCK_BYTES = 8 * 1024 * 1024
# Explicit scoped-VMEM request: 48 MiB leaves headroom vs v7x's 64 MiB physical
# VMEM (and is far below v5e/v6e's 128 MiB).
_VMEM_LIMIT_BYTES = 48 * 1024 * 1024


def _copy_kernel(x_ref, o_ref):
    # Identity pass-through of the current tile (cost fully hidden under the
    # HBM DMA on every generation; no body micro-opt needed).
    o_ref[...] = x_ref[...]


def _grid_semantics():
    """CORE_PARALLEL on v7x (2 TensorCores/chip) so both cores issue DMAs on a
    pure copy; PARALLEL elsewhere (single-TC chips: no codegen delta)."""
    kind = jax.devices()[0].device_kind.lower()
    if "7x" in kind or "v7" in kind:
        return (pltpu.CORE_PARALLEL,)
    return (pltpu.PARALLEL,)


def _pick_lane_width(total: int) -> int:
    """Pick a lane-dense width (multiple of 128) that evenly divides `total`,
    preferring widths that leave rows a multiple of 8 (dense sublanes) with at
    least 8 rows.  Returns 0 if no 128-multiple divides total."""
    candidates = (4096, 2048, 1024, 512, 256, 128)
    for w in candidates:
        if total % w == 0:
            rows = total // w
            if rows >= _SUBLANE and rows % _SUBLANE == 0:
                return w
    for w in candidates:
        if total % w == 0:
            return w
    return 0


def _copy_2d(x2d: jax.Array) -> jax.Array:
    """Row-tiled lane-dense Pallas copy of a 2-D slab (last dim multiple of 128)."""
    rows, width = x2d.shape
    itemsize = jnp.dtype(x2d.dtype).itemsize
    max_rows = max(_SUBLANE, _MAX_BLOCK_BYTES // (width * itemsize))

    if rows <= max_rows:
        block_rows = rows                                  # full-extent block (always legal)
    else:
        block_rows = (max_rows // _SUBLANE) * _SUBLANE     # >= 8, multiple of 8; tail masked
    grid = (pl.cdiv(rows, block_rows),)

    return pl.pallas_call(
        _copy_kernel,
        out_shape=jax.ShapeDtypeStruct((rows, width), x2d.dtype),
        grid=grid,
        in_specs=[pl.BlockSpec((block_rows, width), lambda i: (i, 0))],
        out_specs=pl.BlockSpec((block_rows, width), lambda i: (i, 0)),
        compiler_params=pltpu.CompilerParams(
            dimension_semantics=_grid_semantics(),
            vmem_limit_bytes=_VMEM_LIMIT_BYTES,
        ),
    )(x2d)


def _pallas_identity_copy(x: jax.Array) -> jax.Array:
    """Identity that materializes a fresh output buffer via a Pallas copy."""
    orig_shape = x.shape
    total = x.size

    lanes = _pick_lane_width(total)
    if lanes == 0:
        # Element count not a multiple of 128: pad to a dense (rows % 8 == 0,
        # 128-lane) slab, copy tiled, slice the valid prefix back.  Avoids the
        # old whole-array-block fallback that could exceed VMEM, and keeps the
        # stores lane-dense / unmasked.
        pad = (-total) % (_SUBLANE * _LANE)
        flat = jnp.pad(jnp.ravel(x), (0, pad))
        out = _copy_2d(flat.reshape(-1, _LANE))
        return out.reshape(-1)[:total].reshape(orig_shape)

    out2d = _copy_2d(x.reshape(total // lanes, lanes))
    return out2d.reshape(orig_shape)


def decoder_forward(x: jax.Array, *, materialize: bool = False) -> jax.Array:
    """Pallas implementation of Decoder.forward.

    The reference forward() raises NotImplementedError; the only defined
    semantics is the module-boundary pass-through (identity on x).

    materialize=False (default): zero-HBM-traffic identity — return the
        caller's buffer untouched (don't tune the copy, eliminate it).
    materialize=True: produce an independent output buffer via a lane-dense,
        tiled Pallas copy running near the HBM copy roofline.
    """
    # TODO(synk): the wrapped `model` has no concrete decoder definition in the
    # reference; replace the identity with real compute once it exists (all
    # tiling / block-size choices here must then be revisited).
    if not materialize:
        return x
    return _pallas_identity_copy(x)


if __name__ == "__main__":
    key = jax.random.PRNGKey(0)
    k1, k2 = jax.random.split(key)

    # Small NCHW input consistent with a conv-style decoder wrapper.
    x = jax.random.normal(k1, (2, 4, 16, 16), dtype=jnp.float32)

    # Zero-traffic default path.
    y_fast = jax.block_until_ready(decoder_forward(x))

    # Pallas tiled-copy path (fresh output buffer).
    y_copy = jax.block_until_ready(decoder_forward(x, materialize=True))

    assert y_fast.shape == x.shape and y_fast.dtype == x.dtype
    assert y_copy.shape == x.shape and y_copy.dtype == x.dtype
    assert bool(jnp.allclose(y_fast, x))
    assert bool(jnp.allclose(y_copy, x))

    # Irregular element count (not a multiple of 128): exercises the
    # pad-and-slice fallback instead of a whole-array block.
    x_odd = jax.random.normal(k2, (3, 5, 7), dtype=jnp.float32)
    y_odd = jax.block_until_ready(decoder_forward(x_odd, materialize=True))
    assert y_odd.shape == x_odd.shape and bool(jnp.allclose(y_odd, x_odd))

    print("KERNEL_OK")
</pallas_src>

<mosaic_0001>
module attributes {stable_mosaic.version = 11 : i64} {
  func.func @_copy_kernel(%arg0: i32, %arg1: memref<8x256xf32, #tpu.memory_space<vmem>>, %arg2: memref<8x256xf32, #tpu.memory_space<vmem>>) attributes {dimension_semantics = [#tpu.dimension_semantics<parallel>], iteration_bounds = array<i64: 1>, scalar_prefetch = 0 : i64, scratch_operands = 0 : i64, tpu.core_type = #tpu.core_type<tc>, window_params = [{transform_indices = @transform_0, window_bounds = array<i64: 8, 256>}, {transform_indices = @transform_1, window_bounds = array<i64: 8, 256>}]} {
    %c0 = arith.constant 0 : index
    %c0_0 = arith.constant 0 : index
    %0 = vector.load %arg1[%c0, %c0_0] : memref<8x256xf32, #tpu.memory_space<vmem>>, vector<8x256xf32>
    %c0_1 = arith.constant 0 : index
    %c0_2 = arith.constant 0 : index
    %1 = vector.load %arg2[%c0_1, %c0_2] : memref<8x256xf32, #tpu.memory_space<vmem>>, vector<8x256xf32>
    tpu.vector_store %arg2[%c0_1, %c0_2], %0 {strides = array<i32>} : memref<8x256xf32, #tpu.memory_space<vmem>>, vector<8x256xf32>,
    return
  }
  func.func @transform_0(%arg0: i32) -> (i32, i32) {
    %c0_i32 = arith.constant 0 : i32
    %c0_i32_0 = arith.constant 0 : i32
    return %arg0, %c0_i32 : i32, i32
  }
  func.func @transform_1(%arg0: i32) -> (i32, i32) {
    %c0_i32 = arith.constant 0 : i32
    %c0_i32_0 = arith.constant 0 : i32
    return %arg0, %c0_i32 : i32, i32
  }
}

</mosaic_0001>

<bundles_post_ra>
// kernel: tpu_custom_call.1
= control target key start
LH: loop header
LB: loop body
LE: loop exit
PB: predicated region body
PF: predicated region fallthrough
CT: control target
= control target key end

     0   :  { %6 = vsyncpa [#allocation3], 0  ;;  %s126_s0 = inlined_call_operand.hbm [shape: f32[8,256], index: 0, kind: input, shape index: {}]   ;;  %s127_s1 = inlined_call_operand.hbm [shape: f32[8,256], index: 1, kind: output, shape index: {}]  }
   0x1   :  { %7 = vsyncpa [#allocation4], 0  ;;  %s90_s6 = smov [#allocation2]   ;;  %s42_s10 = scalar_lea.hbm %s126_s0, 256 }
   0x2   :  { %s14_s7 = sshll.u32 %s90_s6, 4  ;;  %p43_p0 = scmp.ne.s32.totalorder %s126_s0, %s42_s10  ;;  %s15_s7 = int_to_ptr.vmem [resolvable:$true] %s14_s7 }
   0x3   :  { %p46_p1 = scmp.lt.u32.totalorder %s42_s10, %s126_s0 }
   0x5   :  { %p48_p2 = pnand %p46_p1, %p43_p0 }
   0x7   :  { %51 = shalt.err (!%p48_p2)
}
   0x8   :  { %s52_s15 = scalar_lea.vmem %s15_s7, 256  ;;  %p57_p4 = scmp.lt.s32.totalorder %s15_s7, %s15_s7 }
   0x9   :  { %p53_p3 = scmp.ne.s32.totalorder %s15_s7, %s52_s15  ;;  %p58_p5 = scmp.lt.s32.totalorder %s52_s15, %s52_s15 }
   0xb   :  { %p59_p6 = por %p58_p5, %p57_p4 }
   0xd   :  { %p60_p7 = pnand %p59_p6, %p53_p3 }
   0xf   :  { %63 = shalt.err (!%p60_p7)
}
  0x10   :  { %17 = dma.hbm_to_vmem [thread:$0]  %s126_s0, 256, %s15_s7, [#allocation3]  }
  0x11   :  { %86 = dma.done.wait [#allocation3], 256  }
  0x12   :  { %87 = vsyncadd [#allocation3], 4294967040  ;;  %s91_s18 = smov [#allocation5]   ;;  %v21_v0 = vld [vmem:[#allocation2] sm:$0xff]  ;;  %v22_v1 = vld [vmem:[#allocation2 + $0x8] sm:$0xff] }
  0x13   :  { %s31_s19 = sshll.u32 %s91_s18, 4  ;;  %23 = vst [vmem:[#allocation5] sm:$0xff] %v21_v0  ;;  %24 = vst [vmem:[#allocation5 + $0x8] sm:$0xff] %v22_v1  ;;  %s32_s19 = int_to_ptr.vmem [resolvable:$true] %s31_s19 }
  0x14   :  { %s64_s20 = scalar_lea.vmem %s32_s19, 256  ;;  %p69_p9 = scmp.lt.s32.totalorder %s32_s19, %s32_s19 }
  0x15   :  { %p65_p8 = scmp.ne.s32.totalorder %s32_s19, %s64_s20  ;;  %p70_p10 = scmp.lt.s32.totalorder %s64_s20, %s64_s20 }
  0x17   :  { %p71_p11 = por %p70_p10, %p69_p9 }
  0x19   :  { %p72_p12 = pnand %p71_p11, %p65_p8 }
  0x1b   :  { %75 = shalt.err (!%p72_p12)
}
  0x1c   :  { %s76_s0 = scalar_lea.hbm %s127_s1, 256 }
  0x1d   :  { %p77_p13 = scmp.ne.s32.totalorder %s127_s1, %s76_s0  ;;  %p80_p0 = scmp.lt.u32.totalorder %s76_s0, %s127_s1 }
  0x1f   :  { %p82_p1 = pnand %p80_p0, %p77_p13 }
  0x21   :  { %85 = shalt.err (!%p82_p1)
}
  0x22   :  { %34 = dma.vmem_to_hbm [thread:$0]  %s32_s19, 256, %s127_s1, [#allocation4]  }
  0x23   :  { %88 = dma.done.wait [#allocation4], 256  }
  0x24   :  { %89 = vsyncadd [#allocation4], 4294967040 }
  0x25   :  { %38 = vsyncpa [#allocation3], 1 }
  0x26   :  { %39 = vsyncpa [#allocation4], 1 }

</bundles_post_ra>
